<compile_context>
chip_gen: v7x
topology: tpu7x:2x2x1
jax: 0.10.0
libtpu: 0.0.40
codegen_flags: <defaults>
</compile_context>

<pallas_src>
import functools

import jax
import jax.numpy as jnp
from jax.experimental import pallas as pl
from jax.experimental.pallas import tpu as pltpu


def _round_up(x, m):
    return ((x + m - 1) // m) * m


def _invariant_spec(shape):
    """BlockSpec for a grid-invariant operand (constant index_map).

    Single-buffered: double-buffering a block that never changes only wastes
    VMEM. Falls back to the default pipeline mode if this JAX build does not
    expose pipeline_mode / pl.Buffered.
    """
    index_map = lambda i: (0, 0)
    if hasattr(pl, "Buffered"):
        try:
            return pl.BlockSpec(shape, index_map, pipeline_mode=pl.Buffered(1))
        except TypeError:
            pass
    return pl.BlockSpec(shape, index_map)


def _treelstm_kernel(*refs, H, Hp, fused):
    if fused:
        hl_ref, hr_ref, cl_ref, cr_ref, w_ref, b_ref, h_ref, c_ref = refs
        mm_dtype = w_ref.dtype
        # K = 2H single dot: fills the 256-deep MXU when H == 128 and removes
        # the full-width add of two partial products. Concat is at a 128-lane
        # boundary (H % 128 == 0) -> pure vreg placement, no shuffle.
        x = jnp.concatenate(
            [hl_ref[...].astype(mm_dtype), hr_ref[...].astype(mm_dtype)],
            axis=-1)
        v = jnp.dot(x, w_ref[...], preferred_element_type=jnp.float32)
    else:
        hl_ref, hr_ref, cl_ref, cr_ref, wl_ref, wr_ref, b_ref, h_ref, c_ref = refs
        mm_dtype = wl_ref.dtype
        # comp_linear([hl|hr]) == hl @ W_top + hr @ W_bot (+ bias), no HBM concat.
        v = (jnp.dot(hl_ref[...].astype(mm_dtype), wl_ref[...],
                     preferred_element_type=jnp.float32)
             + jnp.dot(hr_ref[...].astype(mm_dtype), wr_ref[...],
                       preferred_element_type=jnp.float32))

    v = v + b_ref[...]          # bias already carries the forget-gate +1.0

    # chunk(5, dim=-1) -> i, fl, fr, u, o ; each gate starts at a
    # 128-lane-aligned offset (g * Hp) in the padded gate layout.
    i_g = v[:, 0 * Hp: 0 * Hp + H]
    fl_g = v[:, 1 * Hp: 1 * Hp + H]
    fr_g = v[:, 2 * Hp: 2 * Hp + H]
    u_g = v[:, 3 * Hp: 3 * Hp + H]
    o_g = v[:, 4 * Hp: 4 * Hp + H]

    cl = cl_ref[...].astype(jnp.float32)
    cr = cr_ref[...].astype(jnp.float32)

    c = (cl * jax.nn.sigmoid(fl_g)
         + cr * jax.nn.sigmoid(fr_g)
         + jnp.tanh(u_g) * jax.nn.sigmoid(i_g))
    h = jax.nn.sigmoid(o_g) * jnp.tanh(c)

    h_ref[...] = h.astype(h_ref.dtype)
    c_ref[...] = c.astype(c_ref.dtype)


def binary_tree_lstm_layer(hl, cl, hr, cr, weight, bias, *,
                           tm=512, matmul_dtype=None):
    """Forward pass of BinaryTreeLSTMLayer.

    hl, cl, hr, cr : (B, S, H) activations (f32 or bf16)
    weight         : (5H, 2H) f32   (as nn.Linear stores it)
    bias           : (5H,)    f32
    matmul_dtype   : None -> f32 matmul operands (closest to the reference);
                     jnp.bfloat16 -> native-rate MXU on v5e and half the
                     weight HBM/VMEM bytes (accumulation stays f32).
    returns (h, c), each (B, S, H), same dtype as hl.
    """
    B, S, H = hl.shape
    rows = B * S
    Hp = _round_up(H, 128)
    w_dtype = jnp.float32 if matmul_dtype is None else matmul_dtype
    fused = (H % 128 == 0) and (H < 256)   # K=2H fills the 256-deep MXU

    # Gate-pad the transposed weight: (2H, 5H) -> (2H, 5*Hp); each gate's H
    # columns sit at a 128-lane-aligned offset, padding columns are zero.
    w_t = weight.T.astype(jnp.float32)                        # (2H, 5H)
    w_pad = jnp.pad(w_t.reshape(2 * H, 5, H),
                    ((0, 0), (0, 0), (0, Hp - H))).reshape(2 * H, 5 * Hp)
    w_pad = w_pad.astype(w_dtype)

    # Bias, gate-padded, with the forget-gate +1.0 folded in (gates 1 and 2).
    b5 = bias.astype(jnp.float32).reshape(5, H)
    b5 = b5.at[1:3].add(1.0)
    b_pad = jnp.pad(b5, ((0, 0), (0, Hp - H))).reshape(1, 5 * Hp)

    hl2 = hl.reshape(rows, H)
    hr2 = hr.reshape(rows, H)
    cl2 = cl.reshape(rows, H)
    cr2 = cr.reshape(rows, H)

    act_itemsize = jnp.dtype(hl.dtype).itemsize
    w_itemsize = jnp.dtype(w_dtype).itemsize

    # ---- Row-tile selection -------------------------------------------------
    # (a) big tiles for HBM-roofline efficiency, (b) >= 2 grid steps so both
    # v7x TensorCores get work, (c) working set fits a 48 MiB budget
    # (weights single-buffered, acts/outs double-buffered, f32 intermediate).
    tm_cap = max(8, _round_up(pl.cdiv(rows, 2), 8))       # megacore split
    tm_eff = max(8, min(_round_up(tm, 8), tm_cap, _round_up(rows, 8)))

    VMEM_BUDGET = 48 * 1024 * 1024

    def _vmem_need(t):
        acts = 4 * 2 * t * H * act_itemsize        # 4 inputs, double-buffered
        outs = 2 * 2 * t * H * act_itemsize        # 2 outputs, double-buffered
        wgts = 2 * H * 5 * Hp * w_itemsize         # single-buffered weights
        bcst = 5 * Hp * 4
        inter = 2 * t * 5 * Hp * 4                 # f32 gate intermediate + slack
        return acts + outs + wgts + bcst + inter

    while tm_eff > 8 and _vmem_need(tm_eff) > VMEM_BUDGET:
        tm_eff = max(8, _round_up(tm_eff // 2, 8))

    grid = (pl.cdiv(rows, tm_eff),)

    # ---- Specs --------------------------------------------------------------
    def _act_spec():
        return pl.BlockSpec((tm_eff, H), lambda i: (i, 0))

    if fused:
        w_args = (w_pad,)
        w_specs = [_invariant_spec((2 * H, 5 * Hp))]
    else:
        w_args = (w_pad[:H], w_pad[H:])              # top half / bottom half
        w_specs = [_invariant_spec((H, 5 * Hp)),
                   _invariant_spec((H, 5 * Hp))]
    b_spec = _invariant_spec((1, 5 * Hp))

    cost = pl.CostEstimate(
        flops=2 * rows * (2 * H) * (5 * Hp),
        transcendentals=6 * rows * H,
        bytes_accessed=(rows * 6 * H * act_itemsize
                        + 2 * H * 5 * Hp * w_itemsize
                        + 5 * Hp * 4),
    )

    kernel = functools.partial(_treelstm_kernel, H=H, Hp=Hp, fused=fused)

    h_flat, c_flat = pl.pallas_call(
        kernel,
        out_shape=(
            jax.ShapeDtypeStruct((rows, H), hl.dtype),
            jax.ShapeDtypeStruct((rows, H), hl.dtype),
        ),
        grid_spec=pltpu.PrefetchScalarGridSpec(
            num_scalar_prefetch=0,
            grid=grid,
            in_specs=[_act_spec(),     # hl
                      _act_spec(),     # hr
                      _act_spec(),     # cl
                      _act_spec(),     # cr
                      *w_specs,        # weight(s), single-buffered
                      b_spec],         # bias, single-buffered
            out_specs=[_act_spec(),    # h
                       _act_spec()],   # c
        ),
        compiler_params=pltpu.CompilerParams(
            dimension_semantics=("parallel",),
            # 56 MiB: valid on v7x (64 MiB physical, ~8 MiB Mosaic headroom),
            # comfortably within v5e/v6e's 128 MiB.
            vmem_limit_bytes=56 * 1024 * 1024,
        ),
        cost_estimate=cost,
    )(hl2, hr2, cl2, cr2, *w_args, b_pad)

    return h_flat.reshape(B, S, H), c_flat.reshape(B, S, H)


def init_params(key, hidden_dim):
    """Deterministic init mirroring reset_parameters():
    orthogonal_(comp_linear.weight) with shape (5H, 2H), bias = 0."""
    a = jax.random.normal(key, (5 * hidden_dim, 2 * hidden_dim), jnp.float32)
    q, r = jnp.linalg.qr(a)               # q: (5H, 2H), orthonormal columns
    q = q * jnp.sign(jnp.diagonal(r))[None, :]
    weight = q                             # (5H, 2H), as nn.Linear stores it
    bias = jnp.zeros((5 * hidden_dim,), jnp.float32)
    return weight, bias


def reference_forward(hl, cl, hr, cr, weight, bias):
    """Pure-JAX reference matching the PyTorch forward exactly."""
    hlr = jnp.concatenate([hl, hr], axis=2)
    v = jnp.einsum("bsd,od->bso", hlr, weight,
                   precision=jax.lax.Precision.HIGHEST) + bias
    H = hl.shape[-1]
    i, fl, fr, u, o = [v[..., k * H:(k + 1) * H] for k in range(5)]
    c = (cl * jax.nn.sigmoid(fl + 1.0)
         + cr * jax.nn.sigmoid(fr + 1.0)
         + jnp.tanh(u) * jax.nn.sigmoid(i))
    h = jax.nn.sigmoid(o) * jnp.tanh(c)
    return h, c


def _run_case(key, B, S, H, atol, rtol):
    k_w, k_hl, k_cl, k_hr, k_cr = jax.random.split(key, 5)
    weight, bias = init_params(k_w, H)
    hl = jax.random.normal(k_hl, (B, S, H), jnp.float32)
    cl = jax.random.normal(k_cl, (B, S, H), jnp.float32)
    hr = jax.random.normal(k_hr, (B, S, H), jnp.float32)
    cr = jax.random.normal(k_cr, (B, S, H), jnp.float32)

    h, c = binary_tree_lstm_layer(hl, cl, hr, cr, weight, bias)
    jax.block_until_ready((h, c))

    h_ref, c_ref = reference_forward(hl, cl, hr, cr, weight, bias)
    assert jnp.allclose(h, h_ref, atol=atol, rtol=rtol), f"h mismatch (H={H})"
    assert jnp.allclose(c, c_ref, atol=atol, rtol=rtol), f"c mismatch (H={H})"


if __name__ == "__main__":
    key = jax.random.PRNGKey(0)
    k1, k2 = jax.random.split(key, 2)

    # Small canonical case (two-dot path, H not a multiple of 128).
    _run_case(k1, B=2, S=8, H=32, atol=2e-5, rtol=2e-5)

    # Fused K=2H path (H == 128). Looser tolerance: the in-kernel dot uses
    # default MXU precision, the reference uses Precision.HIGHEST.
    _run_case(k2, B=2, S=4, H=128, atol=1e-4, rtol=1e-4)

    print("KERNEL_OK")
</pallas_src>

<mosaic_0001>
module attributes {stable_mosaic.version = 11 : i64} {
  func.func @_treelstm_kernel(%arg0: i32, %arg1: memref<8x32xf32, #tpu.memory_space<vmem>>, %arg2: memref<8x32xf32, #tpu.memory_space<vmem>>, %arg3: memref<8x32xf32, #tpu.memory_space<vmem>>, %arg4: memref<8x32xf32, #tpu.memory_space<vmem>>, %arg5: memref<32x640xf32, #tpu.memory_space<vmem>>, %arg6: memref<32x640xf32, #tpu.memory_space<vmem>>, %arg7: memref<1x640xf32, #tpu.memory_space<vmem>>, %arg8: memref<8x32xf32, #tpu.memory_space<vmem>>, %arg9: memref<8x32xf32, #tpu.memory_space<vmem>>) attributes {dimension_semantics = [#tpu.dimension_semantics<parallel>], iteration_bounds = array<i64: 2>, scalar_prefetch = 0 : i64, scratch_operands = 0 : i64, tpu.core_type = #tpu.core_type<tc>, window_params = [{transform_indices = @transform_0, window_bounds = array<i64: 8, 32>}, {transform_indices = @transform_1, window_bounds = array<i64: 8, 32>}, {transform_indices = @transform_2, window_bounds = array<i64: 8, 32>}, {transform_indices = @transform_3, window_bounds = array<i64: 8, 32>}, {pipeline_mode = #tpu.pipeline_mode<synchronous>, transform_indices = @transform_4, window_bounds = array<i64: 32, 640>}, {pipeline_mode = #tpu.pipeline_mode<synchronous>, transform_indices = @transform_5, window_bounds = array<i64: 32, 640>}, {pipeline_mode = #tpu.pipeline_mode<synchronous>, transform_indices = @transform_6, window_bounds = array<i64: 1, 640>}, {transform_indices = @transform_7, window_bounds = array<i64: 8, 32>}, {transform_indices = @transform_8, window_bounds = array<i64: 8, 32>}]} {
    %c0 = arith.constant 0 : index
    %c0_0 = arith.constant 0 : index
    %0 = vector.load %arg1[%c0, %c0_0] : memref<8x32xf32, #tpu.memory_space<vmem>>, vector<8x32xf32>
    %c0_1 = arith.constant 0 : index
    %c0_2 = arith.constant 0 : index
    %1 = vector.load %arg5[%c0_1, %c0_2] : memref<32x640xf32, #tpu.memory_space<vmem>>, vector<32x640xf32>
    %cst = arith.constant dense<0.000000e+00> : vector<8x640xf32>
    %2 = tpu.matmul %0, %1, %cst {dimension_numbers = #tpu.dot_dimension_numbers<[1], [0], [0], [1], [0, 0, 1, 1], [], []>} : vector<8x32xf32>, vector<32x640xf32>, vector<8x640xf32> -> vector<8x640xf32>
    %c0_3 = arith.constant 0 : index
    %c0_4 = arith.constant 0 : index
    %3 = vector.load %arg2[%c0_3, %c0_4] : memref<8x32xf32, #tpu.memory_space<vmem>>, vector<8x32xf32>
    %c0_5 = arith.constant 0 : index
    %c0_6 = arith.constant 0 : index
    %4 = vector.load %arg6[%c0_5, %c0_6] : memref<32x640xf32, #tpu.memory_space<vmem>>, vector<32x640xf32>
    %cst_7 = arith.constant dense<0.000000e+00> : vector<8x640xf32>
    %5 = tpu.matmul %3, %4, %cst_7 {dimension_numbers = #tpu.dot_dimension_numbers<[1], [0], [0], [1], [0, 0, 1, 1], [], []>} : vector<8x32xf32>, vector<32x640xf32>, vector<8x640xf32> -> vector<8x640xf32>
    %6 = arith.addf %2, %5 : vector<8x640xf32>
    %c0_8 = arith.constant 0 : index
    %c0_9 = arith.constant 0 : index
    %7 = vector.load %arg7[%c0_8, %c0_9] : memref<1x640xf32, #tpu.memory_space<vmem>>, vector<1x640xf32>
    %8 = vector.broadcast %7 : vector<1x640xf32> to vector<8x640xf32>
    %9 = arith.addf %6, %8 : vector<8x640xf32>
    %10 = vector.extract_strided_slice %9 {offsets = [0, 0], sizes = [8, 32], strides = [1, 1]} : vector<8x640xf32> to vector<8x32xf32>
    %11 = vector.extract_strided_slice %9 {offsets = [0, 128], sizes = [8, 32], strides = [1, 1]} : vector<8x640xf32> to vector<8x32xf32>
    %12 = vector.extract_strided_slice %9 {offsets = [0, 256], sizes = [8, 32], strides = [1, 1]} : vector<8x640xf32> to vector<8x32xf32>
    %13 = vector.extract_strided_slice %9 {offsets = [0, 384], sizes = [8, 32], strides = [1, 1]} : vector<8x640xf32> to vector<8x32xf32>
    %14 = vector.extract_strided_slice %9 {offsets = [0, 512], sizes = [8, 32], strides = [1, 1]} : vector<8x640xf32> to vector<8x32xf32>
    %c0_10 = arith.constant 0 : index
    %c0_11 = arith.constant 0 : index
    %15 = vector.load %arg3[%c0_10, %c0_11] : memref<8x32xf32, #tpu.memory_space<vmem>>, vector<8x32xf32>
    %c0_12 = arith.constant 0 : index
    %c0_13 = arith.constant 0 : index
    %16 = vector.load %arg4[%c0_12, %c0_13] : memref<8x32xf32, #tpu.memory_space<vmem>>, vector<8x32xf32>
    %17 = arith.negf %11 : vector<8x32xf32>
    %18 = math.exp %17 : vector<8x32xf32>
    %cst_14 = arith.constant 1.000000e+00 : f32
    %19 = vector.broadcast %cst_14 : f32 to vector<8x32xf32>
    %20 = arith.addf %19, %18 : vector<8x32xf32>
    %21 = arith.divf %19, %20 : vector<8x32xf32>
    %22 = arith.mulf %15, %21 : vector<8x32xf32>
    %23 = arith.negf %12 : vector<8x32xf32>
    %24 = math.exp %23 : vector<8x32xf32>
    %cst_15 = arith.constant 1.000000e+00 : f32
    %25 = vector.broadcast %cst_15 : f32 to vector<8x32xf32>
    %26 = arith.addf %25, %24 : vector<8x32xf32>
    %27 = arith.divf %25, %26 : vector<8x32xf32>
    %28 = arith.mulf %16, %27 : vector<8x32xf32>
    %29 = arith.addf %22, %28 : vector<8x32xf32>
    %30 = math.tanh %13 : vector<8x32xf32>
    %31 = arith.negf %10 : vector<8x32xf32>
    %32 = math.exp %31 : vector<8x32xf32>
    %cst_16 = arith.constant 1.000000e+00 : f32
    %33 = vector.broadcast %cst_16 : f32 to vector<8x32xf32>
    %34 = arith.addf %33, %32 : vector<8x32xf32>
    %35 = arith.divf %33, %34 : vector<8x32xf32>
    %36 = arith.mulf %30, %35 : vector<8x32xf32>
    %37 = arith.addf %29, %36 : vector<8x32xf32>
    %38 = arith.negf %14 : vector<8x32xf32>
    %39 = math.exp %38 : vector<8x32xf32>
    %cst_17 = arith.constant 1.000000e+00 : f32
    %40 = vector.broadcast %cst_17 : f32 to vector<8x32xf32>
    %41 = arith.addf %40, %39 : vector<8x32xf32>
    %42 = arith.divf %40, %41 : vector<8x32xf32>
    %43 = math.tanh %37 : vector<8x32xf32>
    %44 = arith.mulf %42, %43 : vector<8x32xf32>
    %c0_18 = arith.constant 0 : index
    %c0_19 = arith.constant 0 : index
    %45 = vector.load %arg8[%c0_18, %c0_19] : memref<8x32xf32, #tpu.memory_space<vmem>>, vector<8x32xf32>
    tpu.vector_store %arg8[%c0_18, %c0_19], %44 {strides = array<i32>} : memref<8x32xf32, #tpu.memory_space<vmem>>, vector<8x32xf32>,
    %c0_20 = arith.constant 0 : index
    %c0_21 = arith.constant 0 : index
    %46 = vector.load %arg9[%c0_20, %c0_21] : memref<8x32xf32, #tpu.memory_space<vmem>>, vector<8x32xf32>
    tpu.vector_store %arg9[%c0_20, %c0_21], %37 {strides = array<i32>} : memref<8x32xf32, #tpu.memory_space<vmem>>, vector<8x32xf32>,
    return
  }
  func.func @transform_0(%arg0: i32) -> (i32, i32) {
    %c0_i32 = arith.constant 0 : i32
    %c0_i32_0 = arith.constant 0 : i32
    return %arg0, %c0_i32 : i32, i32
  }
  func.func @transform_1(%arg0: i32) -> (i32, i32) {
    %c0_i32 = arith.constant 0 : i32
    %c0_i32_0 = arith.constant 0 : i32
    return %arg0, %c0_i32 : i32, i32
  }
  func.func @transform_2(%arg0: i32) -> (i32, i32) {
    %c0_i32 = arith.constant 0 : i32
    %c0_i32_0 = arith.constant 0 : i32
    return %arg0, %c0_i32 : i32, i32
  }
  func.func @transform_3(%arg0: i32) -> (i32, i32) {
    %c0_i32 = arith.constant 0 : i32
    %c0_i32_0 = arith.constant 0 : i32
    return %arg0, %c0_i32 : i32, i32
  }
  func.func @transform_4(%arg0: i32) -> (i32, i32) {
    %c0_i32 = arith.constant 0 : i32
    %c0_i32_0 = arith.constant 0 : i32
    %c0_i32_1 = arith.constant 0 : i32
    return %c0_i32, %c0_i32_0 : i32, i32
  }
  func.func @transform_5(%arg0: i32) -> (i32, i32) {
    %c0_i32 = arith.constant 0 : i32
    %c0_i32_0 = arith.constant 0 : i32
    %c0_i32_1 = arith.constant 0 : i32
    return %c0_i32, %c0_i32_0 : i32, i32
  }
  func.func @transform_6(%arg0: i32) -> (i32, i32) {
    %c0_i32 = arith.constant 0 : i32
    %c0_i32_0 = arith.constant 0 : i32
    %c0_i32_1 = arith.constant 0 : i32
    return %c0_i32, %c0_i32_0 : i32, i32
  }
  func.func @transform_7(%arg0: i32) -> (i32, i32) {
    %c0_i32 = arith.constant 0 : i32
    %c0_i32_0 = arith.constant 0 : i32
    return %arg0, %c0_i32 : i32, i32
  }
  func.func @transform_8(%arg0: i32) -> (i32, i32) {
    %c0_i32 = arith.constant 0 : i32
    %c0_i32_0 = arith.constant 0 : i32
    return %arg0, %c0_i32 : i32, i32
  }
}

</mosaic_0001>

<bundles_post_ra>
// kernel: tpu_custom_call.1
= control target key start
LH: loop header
LB: loop body
LE: loop exit
PB: predicated region body
PF: predicated region fallthrough
CT: control target
= control target key end

     0   :  { %s2217_s0 = inlined_call_operand.hbm [shape: f32[16,32], index: 0, kind: input, shape index: {}]   ;;  %s2218_s1 = inlined_call_operand.hbm [shape: f32[16,32], index: 1, kind: input, shape index: {}]   ;;  %s2219_s2 = inlined_call_operand.hbm [shape: f32[16,32], index: 2, kind: input, shape index: {}]   ;;  %s2220_s3 = inlined_call_operand.hbm [shape: f32[16,32], index: 3, kind: input, shape index: {}]   ;;  %s2221_s4 = inlined_call_operand.hbm [shape: f32[32,640], index: 4, kind: input, shape index: {}]   ;;  %s2222_s5 = inlined_call_operand.hbm [shape: f32[32,640], index: 5, kind: input, shape index: {}]   ;;  %s2223_s6 = inlined_call_operand.vmem [shape: f32[1,640], index: 6, kind: input, shape index: {}]   ;;  %s2224_s7 = inlined_call_operand.hbm [shape: f32[16,32], index: 7, kind: output, shape index: {0}]   ;;  %s2225_s8 = inlined_call_operand.hbm [shape: f32[16,32], index: 8, kind: output, shape index: {1}]  }
   0x1   :  { %2247 = sst [smem:[#allocation27_spill]] %s2217_s0 }
   0x2   :  { %2248 = sst [smem:[#allocation28_spill]] %s2218_s1 }
   0x3   :  { %2249 = sst [smem:[#allocation29_spill]] %s2221_s4 }
   0x4   :  { %2250 = sst [smem:[#allocation30_spill]] %s2224_s7 }
   0x5   :  { %2251 = sst [smem:[#allocation31_spill]] %s2225_s8 }
   0x6   :  { %14 = vsyncpa [#allocation3], 0 }
   0x7   :  { %16 = vsyncpa [#allocation3 + $0x1], 0 }
   0x8   :  { %17 = vsyncpa [#allocation6], 0 }
   0x9   :  { %19 = vsyncpa [#allocation6 + $0x1], 0 }
   0xa   :  { %20 = vsyncpa [#allocation9], 0 }
   0xb   :  { %22 = vsyncpa [#allocation9 + $0x1], 0 }
   0xc   :  { %23 = vsyncpa [#allocation12], 0 }
   0xd   :  { %24 = vsyncpa [#allocation4], 0 }
   0xe   :  { %26 = vsyncpa [#allocation4 + $0x1], 0 }
   0xf   :  { %27 = vsyncpa [#allocation15], 0 }
  0x10   :  { %29 = vsyncpa [#allocation15 + $0x1], 0  ;;  %s1809_s27 = smov 0   ;;  %s1811_s28 = smov 0  }
  0x11   :  { %s1813_s29 = smov 0   ;;  %s1815_s30 = smov 0  }
  0x12 LB: > { %2252 = sst [smem:[#allocation23_spill]] %s1737_s27  ;;  %s1830_s9 = sadd.s32 4294967295, %s1749_s30   ;;  %s1749_s30 = sphi %s1815_s30, %s2291_s30   ;;  %s1745_s29 = sphi %s1813_s29, %s2295_s29   ;;  %s1741_s28 = sphi %s1811_s28, %s2294_s28   ;;  %s1737_s27 = sphi %s1809_s27, %s2293_s27  }
  0x13   : > { %s1229_s10 = sadd.s32 4294967294, %s1749_s30   ;;  %p55_p0 = scmp.ne.s32.totalorder %s1741_s28, %s1737_s27 }
  0x14   : > { %p2226_p1 = scmp.eq.s32.totalorder %s1830_s9, 0  ;;  %p226_p3 = scmp.eq.s32.totalorder %s1229_s10, 1 }
  0x15   : > { %p1230_p5 = scmp.ge.s32.totalorder %s1749_s30, 1  ;;  %p259_p7 = scmp.lt.s32.totalorder %s1749_s30, 3 }
  0x16   : > { %p1839_p4 = por %p2226_p1, %p55_p0  ;;  %p1844_p6 = por %p226_p3, %p55_p0 }
  0x17   : > { %p1849_p8 = pnand %p1230_p5, %p259_p7  ;;  %s1751_s14 = smov [#allocation10]  }
  0x18   : > { %s2253_s11 = scalar_select %p1839_p4, 1, 0 }
  0x19   : > { %s2254_s12 = scalar_select %p1844_p6, 1, 0 }
  0x1a   : > { %s2256_s13 = scalar_select %p1849_p8, 1, 0 }
  0x1b   : > { %2255 = sst [smem:[#allocation24_spill]] %s2254_s12  ;;  %s271_s15 = sshll.u32 %s1751_s14, 4  ;;  %s1853_s15 = int_to_ptr.vmem [resolvable:$true] %s271_s15 }
  0x1c   : > { %p1367_p9 = pneg %p1849_p8  ;;  %s1865_s17 = sadd.s32 1, %s1749_s30  }
  0x1d   : > { %2258 = sst [smem:[#allocation25_spill]] %s1865_s17  ;;  %s42_s18 = sadd.s32 1, %s1745_s29 }
  0x1e   : > { %p1860_p11 = pnand %p1367_p9, %p2226_p1  ;;  %s39_s19 = ssub.s32 %s1749_s30, %s1865_s17 }
  0x1f   : > { %s2259_s4 = sld [smem:[#allocation29_spill]] }
  0x20   : > { %s2257_s16 = scalar_select %p1860_p11, 1, 0 }
  0x21   : > { %p2233_p13 = pneg %p1860_p11 }
  0x25   : > { %s1459_s22 = scalar_lea.hbm %s2259_s4, 2560 }
  0x26   : > { %p1460_p12 = scmp.ne.s32.totalorder %s2259_s4, %s1459_s22  ;;  %p1466_p5 = scmp.lt.u32.totalorder %s1459_s22, %s2259_s4 }
  0x28   : > { %p1462_p0 = pnand %p2233_p13, %p1460_p12 }
  0x2a   : > { %p1463_p3 = pneg %p1462_p0 }
  0x2c   : > { %p1468_p7 = pnand %p1466_p5, %p1463_p3 }
  0x2e   : > { %1471 = shalt.err (!%p1468_p7)
}
  0x2f   : > { %s1472_s10 = scalar_lea.vmem %s1853_s15, 2560  ;;  %p1480_p2 = scmp.lt.s32.totalorder %s1853_s15, %s1853_s15 }
  0x30   : > { %p1473_p9 = scmp.ne.s32.totalorder %s1853_s15, %s1472_s10  ;;  %p1481_p12 = scmp.lt.s32.totalorder %s1472_s10, %s1472_s10 }
  0x32   : > { %p1475_p10 = pnand %p1473_p9, %p2233_p13  ;;  %p1482_p0 = por %p1481_p12, %p1480_p2 }
  0x34   : > { %p1476_p1 = pneg %p1475_p10 }
  0x36   : > { %p1483_p6 = pnand %p1482_p0, %p1476_p1 }
  0x38   : > { %1486 = shalt.err (!%p1483_p6)
}
  0x39   : > { %s2227_s14 = smov 640   ;;  %s2228_s20 = smov 40  }
  0x3a   : > { %1370 = dma.hbm_to_vmem [thread:$0]  (!%p1860_p11), %s2259_s4, 2560, %s1853_s15, [#allocation9], %s2227_s14, %s2227_s14, %s2228_s20  }
  0x3b   : > { %p40_p1 = scmp.eq.s32.totalorder %s39_s19, 0  ;;  %p49_p2 = scmp.ne.s32.totalorder %s1745_s29, %s1741_s28 }
  0x3c   : > { %p50_p6 = scmp.eq.s32.totalorder %s1749_s30, 0  ;;  %p1396_p10 = scmp.lt.s32.totalorder %s1749_s30, 2 }
  0x3d   : > { %s1905_s23 = scalar_select %p40_p1, %s1745_s29, %s42_s18  }
  0x3e   : > { %p51_p3 = por %p50_p6, %p49_p2  ;;  %p2261_p5 = scmp.eq.s32.totalorder %s1830_s9, 1 }
  0x3f   : > { %2260 = sst [smem:[#allocation26_spill]] %s1905_s23  ;;  %s2229_s25 = sand.u32 1, %s1745_s29  }
  0x40   : > { %p1909_p7 = por %p2261_p5, %p49_p2  ;;  %s1915_s26 = sshll.u32 %s1749_s30, 7 }
  0x41   : > { %s1919_s10 = sshll.u32 %s2229_s25, 3  ;;  %p1921_p9 = pnand %p1396_p10, %p51_p3 }
  0x42   : > { %s2262_s24 = scalar_select %p1909_p7, 1, 0 }
  0x43   : > { %s2263_s15 = scalar_select %p1921_p9, 1, 0 }
  0x44   : > { %s2235_s18 = sand.u32 1, %s1749_s30   ;;  %s2264_s1 = sld [smem:[#allocation28_spill]] }
  0x45   : > { %s323_s14 = scalar_lea.vmem [#allocation5], %s1919_s10  ;;  %s1937_s25 = scalar_lea.sflag [#allocation6], %s2235_s18 }
  0x46   : > { %s330_s20 = sshll.u32 %s323_s14, 4  ;;  %p1943_p0 = pneg %p1921_p9  ;;  %s1933_s20 = int_to_ptr.vmem [resolvable:$true] %s330_s20 }
  0x48   : > { %s2265_s23 = scalar_select %p1943_p0, 1, 0 }
  0x4a   : > { %s1930_s22 = scalar_lea.hbm %s2264_s1, %s1915_s26  ;;  %s1492_s14 = scalar_lea.hbm %s2264_s1, 256 }
  0x4b   : > { %s1487_s4 = scalar_lea.hbm %s1930_s22, 128  ;;  %p1493_p6 = scmp.lt.u32.totalorder %s1930_s22, %s2264_s1 }
  0x4c   : > { %p1488_p12 = scmp.ne.s32.totalorder %s1930_s22, %s1487_s4  ;;  %p1494_p10 = scmp.lt.u32.totalorder %s1492_s14, %s1487_s4 }
  0x4d   : > { %p1496_p5 = scmp.lt.u32.totalorder %s1487_s4, %s1930_s22 }
  0x4e   : > { %p1490_p1 = pnand %p1943_p0, %p1488_p12  ;;  %p1495_p3 = por %p1494_p10, %p1493_p6 }
  0x50   : > { %p1491_p2 = pneg %p1490_p1  ;;  %p1497_p13 = por %p1496_p5, %p1495_p3 }
  0x52   : > { %p1498_p7 = pnand %p1497_p13, %p1491_p2 }
  0x54   : > { %1501 = shalt.err (!%p1498_p7)
}
  0x55   : > { %s1502_s18 = scalar_lea.vmem %s1933_s20, 128  ;;  %s1754_s19 = smov [#allocation5]  }
  0x56   : > { %p1503_p12 = scmp.ne.s32.totalorder %s1933_s20, %s1502_s18  ;;  %s1507_s21 = sshll.u32 %s1754_s19, 4  ;;  %s1508_s21 = int_to_ptr.vmem [resolvable:$false] %s1507_s21 }
  0x57   : > { %s1509_s12 = scalar_lea.vmem %s1508_s21, 256  ;;  %p1510_p8 = scmp.lt.s32.totalorder %s1933_s20, %s1508_s21 }
  0x58   : > { %p1505_p1 = pnand %p1503_p12, %p1943_p0  ;;  %p1511_p11 = scmp.lt.s32.totalorder %s1509_s12, %s1502_s18 }
  0x5a   : > { %p1506_p4 = pneg %p1505_p1  ;;  %p1512_p6 = por %p1511_p11, %p1510_p8 }
  0x5c   : > { %p1513_p10 = pnand %p1512_p6, %p1506_p4 }
  0x5e   : > { %1516 = shalt.err (!%p1513_p10)
}
  0x5f   : > { %1380 = dma.hbm_to_vmem [thread:$0]  (!%p1921_p9), %s1930_s22, 128, %s1933_s20, %s1937_s25  }
  0x60   : > { %s1755_s4 = smov [#allocation11]   ;;  %s2266_s0 = sld [smem:[#allocation27_spill]] }
  0x61   : > { %s284_s17 = sshll.u32 %s1755_s4, 4  ;;  %s1517_s12 = scalar_lea.hbm %s2222_s5, 2560  ;;  %s285_s17 = int_to_ptr.vmem [resolvable:$true] %s284_s17 }
  0x62   : > { %p1518_p4 = scmp.ne.s32.totalorder %s2222_s5, %s1517_s12  ;;  %p2267_p8 = scmp.ne.s32.totalorder %s2257_s16, 0 }
  0x63   : > { %p1524_p2 = scmp.lt.u32.totalorder %s1517_s12, %s2222_s5 }
  0x64   : > { %p2268_p11 = pneg %p2267_p8 }
  0x66   : > { %s1971_s1 = scalar_lea.hbm %s2266_s0, %s1915_s26  ;;  %p1520_p13 = pnand %p1518_p4, %p2268_p11 }
  0x68   : > { %p1521_p7 = pneg %p1520_p13 }
  0x6a   : > { %p1526_p3 = pnand %p1524_p2, %p1521_p7 }
  0x6c   : > { %1529 = shalt.err (!%p1526_p3)
}
  0x6d   : > { %s1530_s4 = scalar_lea.vmem %s285_s17, 2560  ;;  %p2269_p12 = pmov %p2268_p11 }
  0x6e   : > { %p1531_p5 = scmp.ne.s32.totalorder %s285_s17, %s1530_s4  ;;  %p1538_p10 = scmp.lt.s32.totalorder %s285_s17, %s285_s17 }
  0x6f   : > { %p1539_p9 = scmp.lt.s32.totalorder %s1530_s4, %s1530_s4 }
  0x70   : > { %p1533_p1 = pnand %p1531_p5, %p2269_p12 }
  0x71   : > { %p1540_p0 = por %p1539_p9, %p1538_p10 }
  0x72   : > { %p1534_p6 = pneg %p1533_p1 }
  0x74   : > { %p1541_p4 = pnand %p1540_p0, %p1534_p6 }
  0x76   : > { %1544 = shalt.err (!%p1541_p4)
}
  0x77   : > { %s2270_s7 = smov 40   ;;  %s2271_s27 = smov 640  }
  0x78   : > { %1373 = dma.hbm_to_vmem [thread:$0]  (!%p2267_p8), %s2222_s5, 2560, %s285_s17, [#allocation12], %s2271_s27, %s2271_s27, %s2270_s7  }
  0x79   : > { %s305_s18 = scalar_lea.vmem [#allocation2], %s1919_s10  ;;  %s2003_s20 = scalar_lea.hbm %s2219_s2, %s1915_s26 }
  0x7a   : > { %s312_s21 = sshll.u32 %s305_s18, 4  ;;  %s2272_s22 = sand.u32 1, %s1745_s29   ;;  %s1997_s21 = int_to_ptr.vmem [resolvable:$true] %s312_s21 }
  0x7b   : > { %s302_s4 = scalar_lea.sflag [#allocation3], %s2272_s22  ;;  %s1545_s14 = scalar_lea.hbm %s1971_s1, 128 }
  0x7c   : > { %p1546_p9 = scmp.ne.s32.totalorder %s1971_s1, %s1545_s14  ;;  %p2273_p0 = scmp.ne.s32.totalorder %s2265_s23, 0 }
  0x7d   : > { %s1550_s17 = scalar_lea.hbm %s2266_s0, 256  ;;  %p1551_p8 = scmp.lt.u32.totalorder %s1971_s1, %s2266_s0 }
  0x7e   : > { %p1548_p11 = pnand %p1546_p9, %p2273_p0  ;;  %p1552_p7 = scmp.lt.u32.totalorder %s1550_s17, %s1545_s14 }
  0x7f   : > { %p1554_p3 = scmp.lt.u32.totalorder %s1545_s14, %s1971_s1 }
  0x80   : > { %p1549_p13 = pneg %p1548_p11  ;;  %p1553_p2 = por %p1552_p7, %p1551_p8 }
  0x82   : > { %p1555_p5 = por %p1554_p3, %p1553_p2 }
  0x84   : > { %p1556_p12 = pnand %p1555_p5, %p1549_p13 }
  0x86   : > { %1559 = shalt.err (!%p1556_p12)
}
  0x87   : > { %s1560_s18 = scalar_lea.vmem %s1997_s21, 128  ;;  %s1756_s8 = smov [#allocation2]  }
  0x88   : > { %p1561_p1 = scmp.ne.s32.totalorder %s1997_s21, %s1560_s18  ;;  %s1565_s16 = sshll.u32 %s1756_s8, 4  ;;  %s1566_s16 = int_to_ptr.vmem [resolvable:$false] %s1565_s16 }
  0x89   : > { %s1567_s12 = scalar_lea.vmem %s1566_s16, 256  ;;  %p1568_p4 = scmp.lt.s32.totalorder %s1997_s21, %s1566_s16 }
  0x8a   : > { %p1563_p6 = pnand %p1561_p1, %p2273_p0  ;;  %p1569_p9 = scmp.lt.s32.totalorder %s1567_s12, %s1560_s18 }
  0x8c   : > { %p1564_p10 = pneg %p1563_p6  ;;  %p1570_p11 = por %p1569_p9, %p1568_p4 }
  0x8e   : > { %p1571_p8 = pnand %p1570_p11, %p1564_p10 }
  0x90   : > { %1574 = shalt.err (!%p1571_p8)
}
  0x91   : > { %p2274_p13 = scmp.ne.s32.totalorder %s2263_s15, 0  ;;  %s341_s22 = scalar_lea.vmem [#allocation7], %s1919_s10 }
  0x92   : > { %s348_s14 = sshll.u32 %s341_s22, 4  ;;  %s2033_s7 = scalar_lea.hbm %s2220_s3, %s1915_s26  ;;  %s349_s14 = int_to_ptr.vmem [resolvable:$true] %s348_s14 }
  0x93   : > { %1377 = dma.hbm_to_vmem [thread:$0]  (!%p2274_p13), %s1971_s1, 128, %s1997_s21, %s302_s4  }
  0x94   : > { %s1575_s27 = scalar_lea.hbm %s2003_s20, 128  ;;  %s1580_s16 = scalar_lea.hbm %s2219_s2, 256 }
  0x95   : > { %p1576_p7 = scmp.ne.s32.totalorder %s2003_s20, %s1575_s27  ;;  %p1581_p5 = scmp.lt.u32.totalorder %s2003_s20, %s2219_s2 }
  0x96   : > { %p1582_p12 = scmp.lt.u32.totalorder %s1580_s16, %s1575_s27  ;;  %p1584_p6 = scmp.lt.u32.totalorder %s1575_s27, %s2003_s20 }
  0x97   : > { %p1578_p2 = pnand %p1576_p7, %p2273_p0 }
  0x98   : > { %p1583_p1 = por %p1582_p12, %p1581_p5 }
  0x99   : > { %p1579_p3 = pneg %p1578_p2 }
  0x9a   : > { %p1585_p10 = por %p1584_p6, %p1583_p1 }
  0x9c   : > { %p1586_p4 = pnand %p1585_p10, %p1579_p3 }
  0x9e   : > { %1589 = shalt.err (!%p1586_p4)
}
  0x9f   : > { %s1590_s1 = scalar_lea.vmem %s349_s14, 128  ;;  %s1757_s26 = smov [#allocation7]  }
  0xa0   : > { %p1591_p9 = scmp.ne.s32.totalorder %s349_s14, %s1590_s1  ;;  %s1595_s21 = sshll.u32 %s1757_s26, 4  ;;  %s1596_s21 = int_to_ptr.vmem [resolvable:$false] %s1595_s21 }
  0xa1   : > { %s1597_s4 = scalar_lea.vmem %s1596_s21, 256  ;;  %p1598_p7 = scmp.lt.s32.totalorder %s349_s14, %s1596_s21 }
  0xa2   : > { %p1593_p11 = pnand %p1591_p9, %p2273_p0  ;;  %p1599_p2 = scmp.lt.s32.totalorder %s1597_s4, %s1590_s1 }
  0xa4   : > { %p1594_p8 = pneg %p1593_p11  ;;  %p1600_p13 = por %p1599_p2, %p1598_p7 }
  0xa6   : > { %p1601_p5 = pnand %p1600_p13, %p1594_p8 }
  0xa8   : > { %1604 = shalt.err (!%p1601_p5)
}
  0xa9   : > { %p2275_p12 = scmp.ne.s32.totalorder %s2263_s15, 0  ;;  %s359_s0 = scalar_lea.vmem [#allocation8], %s1919_s10 }
  0xaa   : > { %s366_s22 = sshll.u32 %s359_s0, 4  ;;  %s2276_s19 = sand.u32 1, %s1749_s30   ;;  %s367_s22 = int_to_ptr.vmem [resolvable:$true] %s366_s22 }
  0xab   : > { %1383 = dma.hbm_to_vmem [thread:$0]  (!%p2275_p12), %s2003_s20, 128, %s349_s14, %s1937_s25  }
  0xac   : > { %s356_s17 = scalar_lea.sflag [#allocation9], %s2276_s19  ;;  %s1605_s27 = scalar_lea.hbm %s2033_s7, 128 }
  0xad   : > { %p1606_p13 = scmp.ne.s32.totalorder %s2033_s7, %s1605_s27  ;;  %s1610_s16 = scalar_lea.hbm %s2220_s3, 256 }
  0xae   : > { %p1611_p6 = scmp.lt.u32.totalorder %s2033_s7, %s2220_s3  ;;  %p1612_p10 = scmp.lt.u32.totalorder %s1610_s16, %s1605_s27 }
  0xaf   : > { %p1608_p3 = pnand %p1606_p13, %p2273_p0  ;;  %p1614_p9 = scmp.lt.u32.totalorder %s1605_s27, %s2033_s7 }
  0xb0   : > { %p1613_p4 = por %p1612_p10, %p1611_p6 }
  0xb1   : > { %p1609_p1 = pneg %p1608_p3 }
  0xb2   : > { %p1615_p11 = por %p1614_p9, %p1613_p4 }
  0xb4   : > { %p1616_p8 = pnand %p1615_p11, %p1609_p1 }
  0xb6   : > { %1619 = shalt.err (!%p1616_p8)
}
  0xb7   : > { %s1620_s25 = scalar_lea.vmem %s367_s22, 128  ;;  %s1758_s10 = smov [#allocation8]  }
  0xb8   : > { %p1621_p7 = scmp.ne.s32.totalorder %s367_s22, %s1620_s25  ;;  %s1625_s20 = sshll.u32 %s1758_s10, 4  ;;  %s1626_s20 = int_to_ptr.vmem [resolvable:$false] %s1625_s20 }
  0xb9   : > { %s1627_s14 = scalar_lea.vmem %s1626_s20, 256  ;;  %p1628_p13 = scmp.lt.s32.totalorder %s367_s22, %s1626_s20 }
  0xba   : > { %p1623_p2 = pnand %p1621_p7, %p2273_p0  ;;  %p1629_p3 = scmp.lt.s32.totalorder %s1627_s14, %s1620_s25 }
  0xbc   : > { %p1624_p5 = pneg %p1623_p2  ;;  %p1630_p12 = por %p1629_p3, %p1628_p13 }
  0xbe   : > { %p1631_p6 = pnand %p1630_p12, %p1624_p5 }
  0xc0   : > { %1634 = shalt.err (!%p1631_p6)
}
  0xc1   : > { %p2277_p10 = scmp.ne.s32.totalorder %s2263_s15, 0  ;;  %p2278_p1 = scmp.ne.s32.totalorder %s2256_s13, 0 }
  0xc2   : > { %s2076_s23 = sand.u32 (!%p2278_p1), 1, %s1741_s28   ;;  %p2279_p0 = scmp.ne.s32.totalorder (!%p2278_p1), %s2253_s11, 0 }
  0xc3   : > { %1386 = dma.hbm_to_vmem [thread:$0]  (!%p2277_p10), %s2033_s7, 128, %s367_s22, %s356_s17  }
  0xc4   : > { %375 = sbr.rel (%p2278_p1) target bundleno = 530 (0x212), region = 48  ;;  %s2079_s26 = sshll.u32 (!%p2278_p1), %s2076_s23, 3 }
  0xc5   : > { %s378_s21 = scalar_lea.sflag (!%p2278_p1), [#allocation3], %s2076_s23  ;;  %s381_s4 = scalar_lea.vmem (!%p2278_p1), [#allocation2], %s2079_s26 }
  0xcb   : > { %1708 = dma.done.wait (%p2279_p0), %s378_s21, 128  }
  0xcc   : > { %1710 = vsyncadd (%p2279_p0), %s378_s21, 4294967168  ;;  %s386_s13 = sand.u32 1, %s1830_s9   ;;  %s390_s7 = scalar_lea.vmem [#allocation5], %s2079_s26 }
  0xcd   : > { %s387_s15 = scalar_lea.sflag [#allocation6], %s386_s13 }
  0xce   : > { %1712 = dma.done.wait (%p2279_p0), %s387_s15, 256  }
  0xcf   : > { %1714 = vsyncadd (%p2279_p0), %s387_s15, 4294967040  ;;  %s399_s0 = scalar_lea.vmem [#allocation7], %s2079_s26  ;;  %s405_s22 = scalar_lea.sflag [#allocation9], %s386_s13 }
  0xd0   : > { %s408_s19 = scalar_lea.vmem [#allocation8], %s2079_s26 }
  0xd1   : > { %1716 = dma.done.wait (%p2279_p0), %s405_s22, 128  }
  0xd2   : > { %1718 = vsyncadd (%p2279_p0), %s405_s22, 4294967168  ;;  %p2280_p12 = scmp.eq.s32.totalorder %s1830_s9, 0 }
  0xd4   : > { %1720 = dma.done.wait (%p2280_p12), [#allocation9], 2560   ;;  %p2281_p4 = pmov %p2280_p12 }
  0xd6   : > { %1722 = vsyncadd (%p2281_p4), [#allocation9], 4294964736  ;;  %p2282_p9 = pmov %p2281_p4 }
  0xd7   : > { %p2283_p11 = pmov %p2281_p4 }
  0xd8   : > { %1724 = dma.done.wait (%p2282_p9), [#allocation12], 2560  }
  0xd9   : > { %1726 = vsyncadd (%p2283_p11), [#allocation12], 4294964736  ;;  %v1759_v0 = vmov 0.0   ;;  %v492_v1 = vld [vmem:[#allocation11 + $0x8] sm:$0xff]  ;;  %v497_v2 = vld [vmem:[#allocation11 + $0x30] sm:$0xff]  ;;  %vm511_vm0 = vcmask 261120  }
  0xda   : > { %650 = vmatprep.mubr.f32.mxu1 %v1759_v0  ;;  %579 = vmatprep.mubr.f32.mxu0 %v1759_v0  ;;  %v494_v3 = vld [vmem:[#allocation11 + $0x18] sm:$0xff]  ;;  %v1299_v4 = vpack.c.bf16 %v497_v2, %v492_v1  ;;  %v499_v5 = vld [vmem:[#allocation11 + $0x40] sm:$0xff]  ;;  %v496_v7 = vld [vmem:[#allocation11 + $0x28] sm:$0xff]  ;;  %v1760_v36 = vmov 0.0|0.0   ;;  %vm1761_vm1 = vmmov 0   ;;  %v944_v1 = vlaneseq  ;;  %s1263_s27 = sshll.u32 %s1830_s9, 7 }
  0xdb   : > { %v491_v6 = vld [vmem:[#allocation11] sm:$0xff]  ;;  %v1307_v8 = vpack.c.bf16 %v499_v5, %v494_v3  ;;  %v493_v10 = vld [vmem:[#allocation11 + $0x10] sm:$0xff]  ;;  %v498_v11 = vld [vmem:[#allocation11 + $0x38] sm:$0xff]  ;;  %s468_s18 = scalar_lea.vmem [#allocation14], %s2079_s26  ;;  %s2284_s1 = sld [smem:[#allocation31_spill]] }
  0xdc   : > { %v1301_v9 = vpack.c.bf16 %v496_v7, %v491_v6  ;;  %v502_v12 = vld [vmem:[#allocation11 + $0x58] sm:$0xff]  ;;  %1300 = vmatprep.subr.bf16.mxu0 %v1299_v4  ;;  %v1309_v13 = vpack.c.bf16 %v498_v11, %v493_v10  ;;  %v507_v14 = vld [vmem:[#allocation11 + $0x80] sm:$0xff]  ;;  %v504_v15 = vld [vmem:[#allocation11 + $0x68] sm:$0xff]  ;;  %v945_v2 = vshrl.u32 %v944_v1, 7  ;;  %s1042_s8 = sshll.u32 %s468_s18, 4  ;;  %s1016_s10 = scalar_lea.sflag [#allocation15], %s2076_s23  ;;  %s2141_s8 = int_to_ptr.vmem [resolvable:$true] %s1042_s8 }
  0xdd   : > { %v509_v16 = vld [vmem:[#allocation11 + $0x90] sm:$0xff]  ;;  %1308 = vmatprep.subr.bf16.mxu1 %v1307_v8  ;;  %v1303_v17 = vpack.c.bf16 %v507_v14, %v502_v12  ;;  %v506_v20 = vld [vmem:[#allocation11 + $0x78] sm:$0xff]  ;;  %v503_v21 = vld [vmem:[#allocation11 + $0x60] sm:$0xff]  ;;  %s1635_s20 = scalar_lea.vmem %s2141_s8, 128  ;;  %p2285_p7 = scmp.ne.s32.totalorder %s2262_s24, 0 }
  0xde   : > { %1302 = vmatpush1.bf16.msra.mxu0 %v1301_v9  ;;  %v1311_v18 = vpack.c.bf16 %v509_v16, %v504_v15  ;;  %v501_v19 = vld [vmem:[#allocation11 + $0x50] sm:$0xff]  ;;  %1310 = vmatpush1.bf16.msra.mxu1 %v1309_v13  ;;  %v508_v23 = vld [vmem:[#allocation11 + $0x88] sm:$0xff]  ;;  %v473_v24 = vld [vmem:[#allocation10 + $0x18] sm:$0xff]  ;;  %v954_v3 = vsub.s32 2, %v945_v2  ;;  %v946_v9 = vsub.s32 0, %v945_v2  ;;  %v950_v11 = vsub.s32 1, %v945_v2  ;;  %p1636_p8 = scmp.ne.s32.totalorder %s2141_s8, %s1635_s20 }
  0xdf   : > { %v1305_v22 = vpack.c.bf16 %v506_v20, %v501_v19  ;;  %1304 = vmatprep.subr.bf16.mxu0 %v1303_v17  ;;  %v1313_v25 = vpack.c.bf16 %v508_v23, %v503_v21  ;;  %v478_v26 = vld [vmem:[#allocation10 + $0x40] sm:$0xff]  ;;  %v500_v28 = vld [vmem:[#allocation11 + $0x48] sm:$0xff]  ;;  %v472_v30 = vld [vmem:[#allocation10 + $0x10] sm:$0xff]  ;;  %v962_v16 = vsub.s32 4, %v945_v2  ;;  %v958_v23 = vsub.s32 3, %v945_v2  ;;  %s1762_s14 = smov [#allocation14]  }
  0xe0   : > { %1312 = vmatprep.subr.bf16.mxu1 %v1311_v18  ;;  %v495_v27 = vld [vmem:[#allocation11 + $0x20] sm:$0xff]  ;;  %v1329_v29 = vpack.c.bf16 %v478_v26, %v473_v24  ;;  %v477_v31 = vld [vmem:[#allocation10 + $0x38] sm:$0xff]  ;;  %v483_v32 = vld [vmem:[#allocation10 + $0x68] sm:$0xff]  ;;  %p1637_p2 = pnand %p1636_p8, %p2285_p7  ;;  %s1639_s21 = sshll.u32 %s1762_s14, 4  ;;  %s1640_s21 = int_to_ptr.vmem [resolvable:$false] %s1639_s21 }
  0xe1   : > { %v490_v33 = vld [vmem:[%s390_s7] sm:$0xff]  ;;  %v1316_v34 = vpack.c.bf16 %v500_v28, %v495_v27  ;;  %v1331_v37 = vpack.c.bf16 %v477_v31, %v472_v30  ;;  %v482_v40 = vld [vmem:[#allocation10 + $0x60] sm:$0xff]  ;;  %v487_v42 = vld [vmem:[#allocation10 + $0x88] sm:$0xff]  ;;  %s2139_s25 = scalar_lea.hbm %s2284_s1, %s1263_s27  ;;  %p1642_p13 = scmp.lt.s32.totalorder %s2141_s8, %s1640_s21 }
  0xe2   : > { %1306 = vmatpush1.bf16.msra.mxu0 %v1305_v22  ;;  %v488_v35 = vld [vmem:[#allocation10 + $0x90] sm:$0xff]  ;;  %1314 = vmatpush1.bf16.msra.mxu1 %v1313_v25  ;;  %v510_v39 = vld [vmem:[#allocation11 + $0x98] sm:$0xff]  ;;  %v471_v43 = vld [vmem:[#allocation10 + $0x8] sm:$0xff]  ;;  %v1335_v46 = vpack.c.bf16 %v487_v42, %v482_v40  ;;  %p1638_p5 = pneg %p1637_p2 }
  0xe3   : > { %1315 = vmatprep.subr.bf16.mxu0 %v1760_v36  ;;  %v505_v38 = vld [vmem:[#allocation11 + $0x70] sm:$0xff]  ;;  %1330 = vmatprep.subr.bf16.mxu1 %v1329_v29  ;;  %v1333_v41 = vpack.c.bf16 %v488_v35, %v483_v32  ;;  %v470_v48 = vld [vmem:[#allocation10] sm:$0xff]  ;;  %v475_v49 = vld [vmem:[#allocation10 + $0x28] sm:$0xff] }
  0xe4   : > { %v476_v44 = vld [vmem:[#allocation10 + $0x30] sm:$0xff]  ;;  %v1319_v45 = vpack.c.bf16 %v510_v39, %v505_v38  ;;  %v474_v50 = vld [vmem:[#allocation10 + $0x20] sm:$0xff]  ;;  %v479_v51 = vld [vmem:[#allocation10 + $0x48] sm:$0xff]  ;;  %v1323_v54 = vpack.c.bf16 %v475_v49, %v470_v48 }
  0xe5   : > { %1251 = vmatmul.mubr.msk.f32.vlgmr.msra.gmra.mrb[0].mxu0 %vm511_vm0, %v490_v33  ;;  %1252 = vmatmul.mubr.msk.f32.vlgmr.msra.gmra.mrb[0].mxu1 %vm511_vm0, %v490_v33  ;;  %v1321_v47 = vpack.c.bf16 %v476_v44, %v471_v43  ;;  %v481_v52 = vld [vmem:[#allocation10 + $0x58] sm:$0xff]  ;;  %v486_v53 = vld [vmem:[#allocation10 + $0x80] sm:$0xff]  ;;  %v1338_v56 = vpack.c.bf16 %v479_v51, %v474_v50  ;;  %v480_v58 = vld [vmem:[#allocation10 + $0x50] sm:$0xff] }
  0xe6   : > { %1317 = vmatpush3.bf16.msra.mxu0 %v1316_v34  ;;  %1332 = vmatpush1.bf16.msra.mxu1 %v1331_v37  ;;  %v469_v55 = vld [vmem:[%s381_s4] sm:$0xff]  ;;  %v1325_v57 = vpack.c.bf16 %v486_v53, %v481_v52  ;;  %v485_v59 = vld [vmem:[#allocation10 + $0x78] sm:$0xff]  ;;  %v484_v60 = vld [vmem:[#allocation10 + $0x70] sm:$0xff]  ;;  %s1641_s4 = scalar_lea.vmem %s1640_s21, 256 }
  0xe7   : > { %1318 = vmatprep.subr.bf16.mxu0 %v1760_v36  ;;  %1334 = vmatprep.subr.bf16.mxu1 %v1333_v41  ;;  %v489_v61 = vld [vmem:[#allocation10 + $0x98] sm:$0xff]  ;;  %v1327_v62 = vpack.c.bf16 %v485_v59, %v480_v58  ;;  %v942_v4 = vld [vmem:[%s2223_s6] sm:$0x1f]  ;;  %p1643_p3 = scmp.lt.s32.totalorder %s1641_s4, %s1635_s20 }
  0xe8   : > { %1285 = vmatprep.mubr.msk.f32.mxu0 %vm1761_vm1, %v1759_v0  ;;  %865 = vmatprep.mubr.f32.mxu1 %v1759_v0  ;;  %v1341_v63 = vpack.c.bf16 %v489_v61, %v484_v60  ;;  %v955_v5 = vrot.slane %v942_v4, %v954_v3  ;;  %v947_v13 = vrot.slane %v942_v4, %v946_v9  ;;  %v975_v40 = vld [vmem:[%s408_s19] sm:$0xff]  ;;  %v974_v41 = vld [vmem:[%s399_s0] sm:$0xff] }
  0xe9   : > { %v951_v14 = vrot.slane %v942_v4, %v950_v11  ;;  %v963_v25 = vrot.slane %v942_v4, %v962_v16  ;;  %v959_v27 = vrot.slane %v942_v4, %v958_v23  ;;  %p1644_p6 = por %p1643_p3, %p1642_p13 }
  0xea   : > { %1320 = vmatpush3.bf16.msra.mxu0 %v1319_v45  ;;  %1336 = vmatpush1.bf16.msra.mxu1 %v1335_v46 }
  0xeb   : > { %1322 = vmatprep.subr.bf16.mxu0 %v1321_v47  ;;  %1337 = vmatprep.subr.bf16.mxu1 %v1760_v36  ;;  %p1645_p10 = pnand %p1644_p6, %p1638_p5 }
  0xed   : > { %1286 = vmatmul.mubr.msk.f32.vlgmr.msra.gmra.mrb[2].mxu0 %vm511_vm0, %v490_v33  ;;  %1255 = vmatmul.mubr.msk.f32.vlgmr.msra.gmra.mrb[0].mxu1 %vm511_vm0, %v469_v55 }
  0xee   : > { %1324 = vmatpush1.bf16.msra.mxu0 %v1323_v54  ;;  %1339 = vmatpush3.bf16.msra.mxu1 %v1338_v56 }
  0xef   : > { %1326 = vmatprep.subr.bf16.mxu0 %v1325_v57  ;;  %1340 = vmatprep.subr.bf16.mxu1 %v1760_v36 }
  0xf0   : > { %794 = vmatprep.mubr.f32.mxu0 %v1759_v0  ;;  %1296 = vmatprep.mubr.msk.f32.mxu1 %vm1761_vm1, %v1759_v0 }
  0xf2   : > { %1328 = vmatpush1.bf16.msra.mxu0 %v1327_v62  ;;  %1342 = vmatpush3.bf16.msra.mxu1 %v1341_v63 }
  0xf5   : > { %1254 = vmatmul.mubr.msk.f32.vlgmr.msra.gmra.mrb[0].mxu0 %vm511_vm0, %v469_v55  ;;  %1297 = vmatmul.mubr.msk.f32.vlgmr.msra.gmra.mrb[2].mxu1 %vm511_vm0, %v469_v55 }
 0x1c0   : > { %v723_v6 = vpop.f32.mrb[2].mxu0  ;;  %v867_v7 = vpop.f32.mrb[0].mxu1 }
 0x1c1   : > { %v1287_v8 = vpop.f32.mrb[3].mxu0  ;;  %v971_v10 = vadd.f32 %v955_v5, %v867_v7  ;;  %v869_v0 = vpop.f32.mrb[1].mxu1 }
 0x1c2   : > { %v972_v30 = vadd.f32 %v959_v27, %v869_v0 }
 0x1c3   : > { %v1258_v12 = vmul.f32 -1.442695, %v971_v10 }
 0x1c5   : > { %1439 = vpow2.f32 %v1258_v12 }
 0x1c8   : > { %v796_v15 = vpop.f32.mrb[0].mxu0  ;;  %v938_v18 = vpop.f32.mrb[2].mxu1 }
 0x1c9   : > { %v969_v17 = vadd.f32 %v947_v13, %v796_v15  ;;  %v798_v19 = vpop.f32.mrb[1].mxu0  ;;  %v939_v20 = vadd.f32 %v938_v18, %v723_v6  ;;  %v1298_v22 = vpop.f32.mrb[3].mxu1 }
 0x1ca   : > { %v970_v21 = vadd.f32 %v951_v14, %v798_v19 }
 0x1cb   : > { %v1259_v24 = vmul.f32 -1.442695, %v969_v17  ;;  %v973_v28 = vadd.f32 %v963_v25, %v939_v20 }
 0x1cc   : > { %v1257_v26 = vmul.f32 -1.442695, %v970_v21 }
 0x1cd   : > { %1441 = vpow2.f32 %v1259_v24  ;;  %v1260_v31 = vmul.f32 -1.442695, %v973_v28 }
 0x1ce   : > { %1443 = vpow2.f32 %v1257_v26 }
 0x1cf   : > { %v1440_v29 = vpop.eup %1439  ;;  %1445 = vtanh.f32 %v972_v30 }
 0x1d0   : > { %v986_v32 = vadd.f32 1.0, %v1440_v29  ;;  %1447 = vpow2.f32 %v1260_v31 }
 0x1d2   : > { %1449 = vrcp.f32 %v986_v32 }
 0x1d7   : > { %v1442_v33 = vpop.eup %1441 }
 0x1d8   : > { %v1444_v34 = vpop.eup %1443  ;;  %v995_v35 = vadd.f32 1.0, %v1442_v33 }
 0x1d9   : > { %v979_v36 = vadd.f32 1.0, %v1444_v34  ;;  %v1446_v37 = vpop.eup %1445 }
 0x1da   : > { %1451 = vrcp.f32 %v995_v35  ;;  %v1448_v38 = vpop.eup %1447 }
 0x1db   : > { %1453 = vrcp.f32 %v979_v36  ;;  %v1003_v47 = vadd.f32 1.0, %v1448_v38 }
 0x1dc   : > { %v1450_v39 = vpop.eup %1449 }
 0x1dd   : > { %v989_v45 = vmul.f32 %v1450_v39, %v975_v40  ;;  %1455 = vrcp.f32 %v1003_v47 }
 0x1e4   : > { %v1452_v42 = vpop.eup %1451 }
 0x1e5   : > { %v1454_v43 = vpop.eup %1453  ;;  %v998_v44 = vmul.f32 %v1452_v42, %v1446_v37 }
 0x1e6   : > { %v982_v46 = vmul.f32 %v1454_v43, %v974_v41 }
 0x1e8   : > { %v990_v48 = vadd.f32 %v989_v45, %v982_v46 }
 0x1ea   : > { %v999_v49 = vadd.f32 %v998_v44, %v990_v48 }
 0x1ec   : > { %1457 = vtanh.f32 %v999_v49  ;;  %1009 = vst.msk [vmem:[%s468_s18] sm:$0xff] %vm511_vm0, %v999_v49 }
 0x1ed   : > { %1648 = shalt.err (!%p1645_p10)
}
 0x1ee   : > { %s1649_s13 = scalar_lea.hbm %s2139_s25, 128  ;;  %s1653_s0 = scalar_lea.hbm %s2284_s1, 256 }
 0x1ef   : > { %p1650_p1 = scmp.ne.s32.totalorder %s2139_s25, %s1649_s13  ;;  %p1654_p4 = scmp.lt.u32.totalorder %s2139_s25, %s2284_s1 }
 0x1f0   : > { %p1655_p9 = scmp.lt.u32.totalorder %s1653_s0, %s1649_s13  ;;  %p1657_p8 = scmp.lt.u32.totalorder %s1649_s13, %s2139_s25 }
 0x1f1   : > { %p1651_p0 = pnand %p1650_p1, %p2285_p7 }
 0x1f2   : > { %p1656_p11 = por %p1655_p9, %p1654_p4 }
 0x1f3   : > { %p1652_p12 = pneg %p1651_p0 }
 0x1f4   : > { %p1658_p2 = por %p1657_p8, %p1656_p11 }
 0x1f6   : > { %p1659_p5 = pnand %p1658_p2, %p1652_p12 }
 0x1f8   : > { %1662 = shalt.err (!%p1659_p5)
}
 0x1f9   : > { %1364 = dma.vmem_to_hbm [thread:$0]  (%p2285_p7), %s2141_s8, 128, %s2139_s25, %s1016_s10   ;;  %v1456_v50 = vpop.eup %1455 }
 0x1fa   : > { %s461_s11 = scalar_lea.vmem [#allocation13], %s2079_s26  ;;  %v1458_v51 = vpop.eup %1457  ;;  %s2286_s12 = sld [smem:[#allocation30_spill]] }
 0x1fb   : > { %s1029_s17 = sshll.u32 %s461_s11, 4  ;;  %v1007_v52 = vmul.f32 %v1458_v51, %v1456_v50  ;;  %s1011_s14 = scalar_lea.sflag [#allocation4], %s2076_s23  ;;  %s2174_s17 = int_to_ptr.vmem [resolvable:$true] %s1029_s17 }
 0x1fc   : > { %s1663_s8 = scalar_lea.vmem %s2174_s17, 128  ;;  %s1763_s26 = smov [#allocation13]  }
 0x1fd   : > { %1008 = vst.msk [vmem:[%s461_s11] sm:$0xff] %vm511_vm0, %v1007_v52  ;;  %p1664_p13 = scmp.ne.s32.totalorder %s2174_s17, %s1663_s8  ;;  %s1667_s9 = sshll.u32 %s1763_s26, 4  ;;  %s1668_s9 = int_to_ptr.vmem [resolvable:$false] %s1667_s9 }
 0x1fe   : > { %s1669_s25 = scalar_lea.vmem %s1668_s9, 256  ;;  %p1670_p10 = scmp.lt.s32.totalorder %s2174_s17, %s1668_s9 }
 0x1ff   : > { %p1665_p3 = pnand %p1664_p13, %p2285_p7  ;;  %p1671_p1 = scmp.lt.s32.totalorder %s1669_s25, %s1663_s8 }
 0x200   : > { %s2172_s20 = scalar_lea.hbm %s2286_s12, %s1263_s27 }
 0x201   : > { %p1666_p6 = pneg %p1665_p3  ;;  %p1672_p0 = por %p1671_p1, %p1670_p10 }
 0x203   : > { %p1673_p12 = pnand %p1672_p0, %p1666_p6 }
 0x205   : > { %1676 = shalt.err (!%p1673_p12)
}
 0x206   : > { %s1677_s23 = scalar_lea.hbm %s2172_s20, 128  ;;  %s1681_s21 = scalar_lea.hbm %s2286_s12, 256 }
 0x207   : > { %p1678_p4 = scmp.ne.s32.totalorder %s2172_s20, %s1677_s23  ;;  %p1682_p8 = scmp.lt.u32.totalorder %s2172_s20, %s2286_s12 }
 0x208   : > { %p1683_p2 = scmp.lt.u32.totalorder %s1681_s21, %s1677_s23  ;;  %p1685_p13 = scmp.lt.u32.totalorder %s1677_s23, %s2172_s20 }
 0x209   : > { %p1679_p9 = pnand %p1678_p4, %p2285_p7 }
 0x20a   : > { %p1684_p5 = por %p1683_p2, %p1682_p8 }
 0x20b   : > { %p1680_p11 = pneg %p1679_p9 }
 0x20c   : > { %p1686_p3 = por %p1685_p13, %p1684_p5 }
 0x20e   : > { %p1687_p6 = pnand %p1686_p3, %p1680_p11 }
 0x210   : > { %1690 = shalt.err (!%p1687_p6)
}
 0x211   : > { %1363 = dma.vmem_to_hbm [thread:$0]  (%p2285_p7), %s2174_s17, 128, %s2172_s20, %s1011_s14  }
 0x212 PF: > { %s2287_s15 = sld [smem:[#allocation23_spill]]  ;;  %s2288_s7 = sld [smem:[#allocation24_spill]] }
 0x213   : > { %p2290_p1 = scmp.ge.s32.totalorder %s1749_s30, 2 }
 0x218   : > { %s1054_s0 = sand.u32 1, %s2287_s15   ;;  %p2289_p10 = scmp.ne.s32.totalorder %s2288_s7, 0 }
 0x219   : > { %s1055_s22 = scalar_lea.sflag [#allocation4], %s1054_s0 }
 0x21a   : > { %p1388_p0 = pnand %p2290_p1, %p2289_p10 }
 0x21c   : > { %1728 = dma.done.wait (!%p1388_p0), %s1055_s22, 128  }
 0x21d   : > { %1730 = vsyncadd (!%p1388_p0), %s1055_s22, 4294967168  ;;  %s1064_s19 = scalar_lea.sflag [#allocation15], %s1054_s0 }
 0x21e   : > { %1732 = dma.done.wait (!%p1388_p0), %s1064_s19, 128  }
 0x21f   : > { %1734 = vsyncadd (!%p1388_p0), %s1064_s19, 4294967168  ;;  %s2291_s30 = sld [smem:[#allocation25_spill]]  ;;  %s2292_s24 = sld [smem:[#allocation26_spill]] }
 0x220   : > { %s2293_s27 = smov %s1741_s28  ;;  %s2294_s28 = smov %s1745_s29 }
 0x225   : > { %p32_p7 = scmp.ge.s32.totalorder %s2291_s30, 4   ;;  %s2295_s29 = smov %s2292_s24 }
 0x227   :  { %34 = sbr.rel (!%p32_p7) target bundleno = 18 (0x12), region = 155 }
 0x22e   :  { %1069 = vsyncpa [#allocation3], 1 }
 0x22f   :  { %1071 = vsyncpa [#allocation3 + $0x1], 1 }
 0x230   :  { %1072 = vsyncpa [#allocation6], 1 }
 0x231   :  { %1074 = vsyncpa [#allocation6 + $0x1], 1 }
 0x232   :  { %1075 = vsyncpa [#allocation9], 1 }
 0x233   :  { %1077 = vsyncpa [#allocation9 + $0x1], 1 }
 0x234   :  { %1078 = vsyncpa [#allocation12], 1 }
 0x235   :  { %1079 = vsyncpa [#allocation4], 1 }
 0x236   :  { %1081 = vsyncpa [#allocation4 + $0x1], 1 }
 0x237   :  { %1082 = vsyncpa [#allocation15], 1 }
 0x238   :  { %1084 = vsyncpa [#allocation15 + $0x1], 1 }

</bundles_post_ra>
